<compile_context>
chip_gen: v7x
topology: tpu7x:2x2x1
jax: 0.10.0
libtpu: 0.0.40
codegen_flags: <defaults>
</compile_context>

<pallas_src>
import jax
import jax.numpy as jnp
from jax.experimental import pallas as pl
from jax.experimental.pallas import tpu as pltpu

_BN_EPS = 1e-5
TILE_B = 128  # batch rows per grid step (fills the MXU M dimension)


# ---------------------------------------------------------------------------
# Kernel
# ---------------------------------------------------------------------------

def _mlp_kernel(x_ref,
                w1_ref, b1_ref, a1_ref,
                w2_ref, b2_ref, a2_ref,
                w2b_ref, b2b_ref, a2b_ref,
                w34_ref, b34_ref,
                o_ref):
    """Fused forward: [Linear(BN folded) -> PReLU] x3 -> merged two-head Linear."""

    def prelu(h, a):
        # PReLU with per-channel alpha, broadcast over batch (f32 on the VPU).
        return jnp.where(h > 0.0, h, a * h)

    def dense(h, w_ref, b_ref):
        # bf16 MXU operands, f32 accumulate; bias add in f32.
        return jnp.dot(h.astype(jnp.bfloat16), w_ref[...],
                       preferred_element_type=jnp.float32) + b_ref[...]

    h = x_ref[...]                                        # (TILE_B, F) f32
    h = prelu(dense(h, w1_ref, b1_ref), a1_ref[...])      # block 1
    h = prelu(dense(h, w2_ref, b2_ref), a2_ref[...])      # block 2
    h = prelu(dense(h, w2b_ref, b2b_ref), a2b_ref[...])   # block 2b
    o_ref[...] = dense(h, w34_ref, b34_ref)               # merged heads 3+4


# ---------------------------------------------------------------------------
# Parameter setup (plain JAX glue — all folding happens here, not in-kernel)
# ---------------------------------------------------------------------------

def _key_iter(key):
    """Never-exhausting key stream (fixes the StopIteration of the old code)."""
    while True:
        key, sub = jax.random.split(key)
        yield sub


def _weight_norm(v, g):
    """PyTorch nn.utils.weight_norm: w = g * v / ||v||, norm over dim=1.
    v: (out, in), g: (out,).  Returns (in, out) for x @ W in the kernel."""
    norm = jnp.sqrt(jnp.sum(v * v, axis=1, keepdims=True))
    w = (g[:, None] / norm) * v            # (out, in)
    return w.T                             # (in, out)


def _fold_bn(gamma, beta, running_mean, running_var):
    """Eval-mode BatchNorm1d as y = x * scale + shift (1-D vectors)."""
    scale = gamma / jnp.sqrt(running_var + _BN_EPS)
    shift = beta - running_mean * scale
    return scale, shift


def _fold_bn_into_linear(scale, shift, w, b):
    """(x*scale + shift) @ W + b  ==  x @ (scale[:,None]*W) + (shift @ W + b)."""
    return scale[:, None] * w, shift @ w + b


def make_params(key, num_features, num_targets_scored, num_targets_nscored,
                hidden_sizes):
    k = _key_iter(key)

    def lin(fan_in, fan_out):
        v = jax.random.normal(next(k), (fan_out, fan_in), jnp.float32) * 0.05
        g = 1.0 + 0.1 * jax.random.normal(next(k), (fan_out,), jnp.float32)
        b = 0.01 * jax.random.normal(next(k), (fan_out,), jnp.float32)
        return _weight_norm(v, g), b

    def bn(n):
        gamma = 1.0 + 0.1 * jax.random.normal(next(k), (n,), jnp.float32)
        beta = 0.05 * jax.random.normal(next(k), (n,), jnp.float32)
        rmean = 0.1 * jax.random.normal(next(k), (n,), jnp.float32)
        rvar = 1.0 + 0.1 * jax.random.uniform(next(k), (n,), jnp.float32)
        return _fold_bn(gamma, beta, rmean, rvar)

    def prelu_alpha(n):
        # Module uses PReLU init=1.0; perturb so the negative branch is exercised.
        return 1.0 + 0.2 * jax.random.normal(next(k), (n,), jnp.float32)

    h1, h2, h3 = hidden_sizes

    s1, t1 = bn(num_features)
    w1, b1 = lin(num_features, h1)
    a1 = prelu_alpha(h1)

    s2, t2 = bn(h1)
    w2, b2 = lin(h1, h2)
    a2 = prelu_alpha(h2)

    s2b, t2b = bn(h2)
    w2b, b2b = lin(h2, h3)
    a2b = prelu_alpha(h3)

    s3, t3 = bn(h3)
    w3, b3 = lin(h3, num_targets_scored)
    w4, b4 = lin(h3, num_targets_nscored)

    # Fold each eval-mode BN into the Linear that follows it.
    w1f, b1f = _fold_bn_into_linear(s1, t1, w1, b1)
    w2f, b2f = _fold_bn_into_linear(s2, t2, w2, b2)
    w2bf, b2bf = _fold_bn_into_linear(s2b, t2b, w2b, b2b)
    w3f, b3f = _fold_bn_into_linear(s3, t3, w3, b3)      # both heads share BN3
    w4f, b4f = _fold_bn_into_linear(s3, t3, w4, b4)

    # Merge the two heads so the kernel does one lane-dense N=(t1+t2) matmul.
    w34 = jnp.concatenate([w3f, w4f], axis=1)
    b34 = jnp.concatenate([b3f, b4f], axis=0)

    def W(w):                                  # bf16 MXU weight
        return w.astype(jnp.bfloat16)

    def V(v):                                  # f32 row-vector (VPU side)
        return v[None, :].astype(jnp.float32)

    return (W(w1f), V(b1f), V(a1),
            W(w2f), V(b2f), V(a2),
            W(w2bf), V(b2bf), V(a2b),
            W(w34), V(b34))


# ---------------------------------------------------------------------------
# Pallas call wrapper
# ---------------------------------------------------------------------------

def model_forward(x, params, num_targets_scored, tile_b=TILE_B):
    (w1, b1, a1, w2, b2, a2, w2b, b2b, a2b, w34, b34) = params
    B, F = x.shape
    h1 = w1.shape[1]
    h2 = w2.shape[1]
    h3 = w2b.shape[1]
    n_out = w34.shape[1]

    # Pad the batch to a multiple of tile_b so every grid step is a full tile.
    Bp = tile_b * pl.cdiv(B, tile_b)
    if Bp != B:
        x = jnp.pad(x, ((0, Bp - B), (0, 0)))

    grid = (Bp // tile_b,)

    def const_spec(arr):
        # Full-array block with a constant index_map: stays VMEM-resident
        # across all batch tiles (no re-DMA per step).
        return pl.BlockSpec(arr.shape, lambda i, _nd=arr.ndim: (0,) * _nd)

    in_specs = [pl.BlockSpec((tile_b, F), lambda i: (i, 0))]
    in_specs += [const_spec(p) for p in params]
    out_specs = pl.BlockSpec((tile_b, n_out), lambda i: (i, 0))

    flops = 2 * Bp * (F * h1 + h1 * h2 + h2 * h3 + h3 * n_out)
    bytes_accessed = (int(x.size) * 4 + Bp * n_out * 4
                      + sum(int(p.size) * p.dtype.itemsize for p in params))

    out = pl.pallas_call(
        _mlp_kernel,
        grid=grid,
        out_shape=jax.ShapeDtypeStruct((Bp, n_out), jnp.float32),
        in_specs=in_specs,
        out_specs=out_specs,
        compiler_params=pltpu.CompilerParams(
            dimension_semantics=("parallel",)),
        cost_estimate=pl.CostEstimate(flops=flops, transcendentals=0,
                                      bytes_accessed=bytes_accessed),
    )(x, *params)

    out = out[:B]
    return out[:, :num_targets_scored], out[:, num_targets_scored:]


def model_forward_ref(x, params, num_targets_scored):
    """Plain-JAX reference of the same eval-mode forward (bf16 MXU, f32 acc)."""
    (w1, b1, a1, w2, b2, a2, w2b, b2b, a2b, w34, b34) = params

    def prelu(h, a):
        return jnp.where(h > 0.0, h, a * h)

    def dense(h, w, b):
        return jnp.dot(h.astype(jnp.bfloat16), w,
                       preferred_element_type=jnp.float32) + b

    h = prelu(dense(x, w1, b1), a1)
    h = prelu(dense(h, w2, b2), a2)
    h = prelu(dense(h, w2b, b2b), a2b)
    o = dense(h, w34, b34)
    return o[:, :num_targets_scored], o[:, num_targets_scored:]


if __name__ == "__main__":
    # Small shapes consistent with the module's forward (tabular MLP).
    batch = 16
    num_features = 128
    hidden_sizes = (256, 128, 128)
    num_targets_scored = 128
    num_targets_nscored = 64

    key = jax.random.PRNGKey(0)
    kx, kp = jax.random.split(key)
    x = jax.random.normal(kx, (batch, num_features), jnp.float32)
    params = make_params(kp, num_features, num_targets_scored,
                         num_targets_nscored, hidden_sizes)

    out1, out2 = jax.block_until_ready(
        model_forward(x, params, num_targets_scored))

    ref1, ref2 = model_forward_ref(x, params, num_targets_scored)
    assert out1.shape == (batch, num_targets_scored)
    assert out2.shape == (batch, num_targets_nscored)
    assert jnp.allclose(out1, ref1, atol=5e-3, rtol=5e-3)
    assert jnp.allclose(out2, ref2, atol=5e-3, rtol=5e-3)

    print("KERNEL_OK")
</pallas_src>

<mosaic_0001>
module attributes {stable_mosaic.version = 11 : i64} {
  func.func @_mlp_kernel(%arg0: i32, %arg1: memref<128x128xf32, #tpu.memory_space<vmem>>, %arg2: memref<128x256xbf16, #tpu.memory_space<vmem>>, %arg3: memref<1x256xf32, #tpu.memory_space<vmem>>, %arg4: memref<1x256xf32, #tpu.memory_space<vmem>>, %arg5: memref<256x128xbf16, #tpu.memory_space<vmem>>, %arg6: memref<1x128xf32, #tpu.memory_space<vmem>>, %arg7: memref<1x128xf32, #tpu.memory_space<vmem>>, %arg8: memref<128x128xbf16, #tpu.memory_space<vmem>>, %arg9: memref<1x128xf32, #tpu.memory_space<vmem>>, %arg10: memref<1x128xf32, #tpu.memory_space<vmem>>, %arg11: memref<128x192xbf16, #tpu.memory_space<vmem>>, %arg12: memref<1x192xf32, #tpu.memory_space<vmem>>, %arg13: memref<128x192xf32, #tpu.memory_space<vmem>>) attributes {dimension_semantics = [#tpu.dimension_semantics<parallel>], iteration_bounds = array<i64: 1>, scalar_prefetch = 0 : i64, scratch_operands = 0 : i64, tpu.core_type = #tpu.core_type<tc>, window_params = [{transform_indices = @transform_0, window_bounds = array<i64: 128, 128>}, {pipeline_mode = #tpu.pipeline_mode<synchronous>, transform_indices = @transform_1, window_bounds = array<i64: 128, 256>}, {pipeline_mode = #tpu.pipeline_mode<synchronous>, transform_indices = @transform_2, window_bounds = array<i64: 1, 256>}, {pipeline_mode = #tpu.pipeline_mode<synchronous>, transform_indices = @transform_3, window_bounds = array<i64: 1, 256>}, {pipeline_mode = #tpu.pipeline_mode<synchronous>, transform_indices = @transform_4, window_bounds = array<i64: 256, 128>}, {pipeline_mode = #tpu.pipeline_mode<synchronous>, transform_indices = @transform_5, window_bounds = array<i64: 1, 128>}, {pipeline_mode = #tpu.pipeline_mode<synchronous>, transform_indices = @transform_6, window_bounds = array<i64: 1, 128>}, {pipeline_mode = #tpu.pipeline_mode<synchronous>, transform_indices = @transform_7, window_bounds = array<i64: 128, 128>}, {pipeline_mode = #tpu.pipeline_mode<synchronous>, transform_indices = @transform_8, window_bounds = array<i64: 1, 128>}, {pipeline_mode = #tpu.pipeline_mode<synchronous>, transform_indices = @transform_9, window_bounds = array<i64: 1, 128>}, {pipeline_mode = #tpu.pipeline_mode<synchronous>, transform_indices = @transform_10, window_bounds = array<i64: 128, 192>}, {pipeline_mode = #tpu.pipeline_mode<synchronous>, transform_indices = @transform_11, window_bounds = array<i64: 1, 192>}, {transform_indices = @transform_12, window_bounds = array<i64: 128, 192>}]} {
    %c0 = arith.constant 0 : index
    %c0_0 = arith.constant 0 : index
    %0 = vector.load %arg1[%c0, %c0_0] : memref<128x128xf32, #tpu.memory_space<vmem>>, vector<128x128xf32>
    %1 = arith.truncf %0 : vector<128x128xf32> to vector<128x128xbf16>
    %c0_1 = arith.constant 0 : index
    %c0_2 = arith.constant 0 : index
    %2 = vector.load %arg2[%c0_1, %c0_2] : memref<128x256xbf16, #tpu.memory_space<vmem>>, vector<128x256xbf16>
    %cst = arith.constant dense<0.000000e+00> : vector<128x256xf32>
    %3 = tpu.matmul %1, %2, %cst {dimension_numbers = #tpu.dot_dimension_numbers<[1], [0], [0], [1], [0, 0, 1, 1], [], []>} : vector<128x128xbf16>, vector<128x256xbf16>, vector<128x256xf32> -> vector<128x256xf32>
    %c0_3 = arith.constant 0 : index
    %c0_4 = arith.constant 0 : index
    %4 = vector.load %arg3[%c0_3, %c0_4] : memref<1x256xf32, #tpu.memory_space<vmem>>, vector<1x256xf32>
    %5 = vector.broadcast %4 : vector<1x256xf32> to vector<128x256xf32>
    %6 = arith.addf %3, %5 : vector<128x256xf32>
    %c0_5 = arith.constant 0 : index
    %c0_6 = arith.constant 0 : index
    %7 = vector.load %arg4[%c0_5, %c0_6] : memref<1x256xf32, #tpu.memory_space<vmem>>, vector<1x256xf32>
    %cst_7 = arith.constant 0.000000e+00 : f32
    %8 = vector.broadcast %cst_7 : f32 to vector<128x256xf32>
    %9 = arith.cmpf ogt, %6, %8 : vector<128x256xf32>
    %10 = vector.broadcast %7 : vector<1x256xf32> to vector<128x256xf32>
    %11 = arith.mulf %10, %6 : vector<128x256xf32>
    %12 = arith.select %9, %6, %11 : vector<128x256xi1>, vector<128x256xf32>
    %13 = arith.truncf %12 : vector<128x256xf32> to vector<128x256xbf16>
    %c0_8 = arith.constant 0 : index
    %c0_9 = arith.constant 0 : index
    %14 = vector.load %arg5[%c0_8, %c0_9] : memref<256x128xbf16, #tpu.memory_space<vmem>>, vector<256x128xbf16>
    %cst_10 = arith.constant dense<0.000000e+00> : vector<128x128xf32>
    %15 = tpu.matmul %13, %14, %cst_10 {dimension_numbers = #tpu.dot_dimension_numbers<[1], [0], [0], [1], [0, 0, 1, 1], [], []>} : vector<128x256xbf16>, vector<256x128xbf16>, vector<128x128xf32> -> vector<128x128xf32>
    %c0_11 = arith.constant 0 : index
    %c0_12 = arith.constant 0 : index
    %16 = vector.load %arg6[%c0_11, %c0_12] : memref<1x128xf32, #tpu.memory_space<vmem>>, vector<1x128xf32>
    %17 = vector.broadcast %16 : vector<1x128xf32> to vector<128x128xf32>
    %18 = arith.addf %15, %17 : vector<128x128xf32>
    %c0_13 = arith.constant 0 : index
    %c0_14 = arith.constant 0 : index
    %19 = vector.load %arg7[%c0_13, %c0_14] : memref<1x128xf32, #tpu.memory_space<vmem>>, vector<1x128xf32>
    %cst_15 = arith.constant 0.000000e+00 : f32
    %20 = vector.broadcast %cst_15 : f32 to vector<128x128xf32>
    %21 = arith.cmpf ogt, %18, %20 : vector<128x128xf32>
    %22 = vector.broadcast %19 : vector<1x128xf32> to vector<128x128xf32>
    %23 = arith.mulf %22, %18 : vector<128x128xf32>
    %24 = arith.select %21, %18, %23 : vector<128x128xi1>, vector<128x128xf32>
    %25 = arith.truncf %24 : vector<128x128xf32> to vector<128x128xbf16>
    %c0_16 = arith.constant 0 : index
    %c0_17 = arith.constant 0 : index
    %26 = vector.load %arg8[%c0_16, %c0_17] : memref<128x128xbf16, #tpu.memory_space<vmem>>, vector<128x128xbf16>
    %cst_18 = arith.constant dense<0.000000e+00> : vector<128x128xf32>
    %27 = tpu.matmul %25, %26, %cst_18 {dimension_numbers = #tpu.dot_dimension_numbers<[1], [0], [0], [1], [0, 0, 1, 1], [], []>} : vector<128x128xbf16>, vector<128x128xbf16>, vector<128x128xf32> -> vector<128x128xf32>
    %c0_19 = arith.constant 0 : index
    %c0_20 = arith.constant 0 : index
    %28 = vector.load %arg9[%c0_19, %c0_20] : memref<1x128xf32, #tpu.memory_space<vmem>>, vector<1x128xf32>
    %29 = vector.broadcast %28 : vector<1x128xf32> to vector<128x128xf32>
    %30 = arith.addf %27, %29 : vector<128x128xf32>
    %c0_21 = arith.constant 0 : index
    %c0_22 = arith.constant 0 : index
    %31 = vector.load %arg10[%c0_21, %c0_22] : memref<1x128xf32, #tpu.memory_space<vmem>>, vector<1x128xf32>
    %cst_23 = arith.constant 0.000000e+00 : f32
    %32 = vector.broadcast %cst_23 : f32 to vector<128x128xf32>
    %33 = arith.cmpf ogt, %30, %32 : vector<128x128xf32>
    %34 = vector.broadcast %31 : vector<1x128xf32> to vector<128x128xf32>
    %35 = arith.mulf %34, %30 : vector<128x128xf32>
    %36 = arith.select %33, %30, %35 : vector<128x128xi1>, vector<128x128xf32>
    %37 = arith.truncf %36 : vector<128x128xf32> to vector<128x128xbf16>
    %c0_24 = arith.constant 0 : index
    %c0_25 = arith.constant 0 : index
    %38 = vector.load %arg11[%c0_24, %c0_25] : memref<128x192xbf16, #tpu.memory_space<vmem>>, vector<128x192xbf16>
    %cst_26 = arith.constant dense<0.000000e+00> : vector<128x192xf32>
    %39 = tpu.matmul %37, %38, %cst_26 {dimension_numbers = #tpu.dot_dimension_numbers<[1], [0], [0], [1], [0, 0, 1, 1], [], []>} : vector<128x128xbf16>, vector<128x192xbf16>, vector<128x192xf32> -> vector<128x192xf32>
    %c0_27 = arith.constant 0 : index
    %c0_28 = arith.constant 0 : index
    %40 = vector.load %arg12[%c0_27, %c0_28] : memref<1x192xf32, #tpu.memory_space<vmem>>, vector<1x192xf32>
    %41 = vector.broadcast %40 : vector<1x192xf32> to vector<128x192xf32>
    %42 = arith.addf %39, %41 : vector<128x192xf32>
    %c0_29 = arith.constant 0 : index
    %c0_30 = arith.constant 0 : index
    %43 = vector.load %arg13[%c0_29, %c0_30] : memref<128x192xf32, #tpu.memory_space<vmem>>, vector<128x192xf32>
    tpu.vector_store %arg13[%c0_29, %c0_30], %42 {strides = array<i32>} : memref<128x192xf32, #tpu.memory_space<vmem>>, vector<128x192xf32>,
    return
  }
  func.func @transform_0(%arg0: i32) -> (i32, i32) {
    %c0_i32 = arith.constant 0 : i32
    %c0_i32_0 = arith.constant 0 : i32
    return %arg0, %c0_i32 : i32, i32
  }
  func.func @transform_1(%arg0: i32) -> (i32, i32) {
    %c0_i32 = arith.constant 0 : i32
    %c0_i32_0 = arith.constant 0 : i32
    %c0_i32_1 = arith.constant 0 : i32
    return %c0_i32, %c0_i32_0 : i32, i32
  }
  func.func @transform_2(%arg0: i32) -> (i32, i32) {
    %c0_i32 = arith.constant 0 : i32
    %c0_i32_0 = arith.constant 0 : i32
    %c0_i32_1 = arith.constant 0 : i32
    return %c0_i32, %c0_i32_0 : i32, i32
  }
  func.func @transform_3(%arg0: i32) -> (i32, i32) {
    %c0_i32 = arith.constant 0 : i32
    %c0_i32_0 = arith.constant 0 : i32
    %c0_i32_1 = arith.constant 0 : i32
    return %c0_i32, %c0_i32_0 : i32, i32
  }
  func.func @transform_4(%arg0: i32) -> (i32, i32) {
    %c0_i32 = arith.constant 0 : i32
    %c0_i32_0 = arith.constant 0 : i32
    %c0_i32_1 = arith.constant 0 : i32
    return %c0_i32, %c0_i32_0 : i32, i32
  }
  func.func @transform_5(%arg0: i32) -> (i32, i32) {
    %c0_i32 = arith.constant 0 : i32
    %c0_i32_0 = arith.constant 0 : i32
    %c0_i32_1 = arith.constant 0 : i32
    return %c0_i32, %c0_i32_0 : i32, i32
  }
  func.func @transform_6(%arg0: i32) -> (i32, i32) {
    %c0_i32 = arith.constant 0 : i32
    %c0_i32_0 = arith.constant 0 : i32
    %c0_i32_1 = arith.constant 0 : i32
    return %c0_i32, %c0_i32_0 : i32, i32
  }
  func.func @transform_7(%arg0: i32) -> (i32, i32) {
    %c0_i32 = arith.constant 0 : i32
    %c0_i32_0 = arith.constant 0 : i32
    %c0_i32_1 = arith.constant 0 : i32
    return %c0_i32, %c0_i32_0 : i32, i32
  }
  func.func @transform_8(%arg0: i32) -> (i32, i32) {
    %c0_i32 = arith.constant 0 : i32
    %c0_i32_0 = arith.constant 0 : i32
    %c0_i32_1 = arith.constant 0 : i32
    return %c0_i32, %c0_i32_0 : i32, i32
  }
  func.func @transform_9(%arg0: i32) -> (i32, i32) {
    %c0_i32 = arith.constant 0 : i32
    %c0_i32_0 = arith.constant 0 : i32
    %c0_i32_1 = arith.constant 0 : i32
    return %c0_i32, %c0_i32_0 : i32, i32
  }
  func.func @transform_10(%arg0: i32) -> (i32, i32) {
    %c0_i32 = arith.constant 0 : i32
    %c0_i32_0 = arith.constant 0 : i32
    %c0_i32_1 = arith.constant 0 : i32
    return %c0_i32, %c0_i32_0 : i32, i32
  }
  func.func @transform_11(%arg0: i32) -> (i32, i32) {
    %c0_i32 = arith.constant 0 : i32
    %c0_i32_0 = arith.constant 0 : i32
    %c0_i32_1 = arith.constant 0 : i32
    return %c0_i32, %c0_i32_0 : i32, i32
  }
  func.func @transform_12(%arg0: i32) -> (i32, i32) {
    %c0_i32 = arith.constant 0 : i32
    %c0_i32_0 = arith.constant 0 : i32
    return %arg0, %c0_i32 : i32, i32
  }
}

</mosaic_0001>

<bundles_post_ra>
// kernel: tpu_custom_call.1
= control target key start
LH: loop header
LB: loop body
LE: loop exit
PB: predicated region body
PF: predicated region fallthrough
CT: control target
= control target key end

     0   :  { %17 = vsyncpa [#allocation3], 0  ;;  %s2139_s0 = inlined_call_operand.vmem [shape: f32[128,128], index: 0, kind: input, shape index: {}]   ;;  %s2140_s1 = inlined_call_operand.hbm [shape: bf16[128,256], index: 1, kind: input, shape index: {}]   ;;  %s2141_s2 = inlined_call_operand.vmem [shape: f32[1,256], index: 2, kind: input, shape index: {}]   ;;  %s2142_s3 = inlined_call_operand.vmem [shape: f32[1,256], index: 3, kind: input, shape index: {}]   ;;  %s2143_s4 = inlined_call_operand.hbm [shape: bf16[256,128], index: 4, kind: input, shape index: {}]   ;;  %s2144_s5 = inlined_call_operand.vmem [shape: f32[1,128], index: 5, kind: input, shape index: {}]   ;;  %s2145_s6 = inlined_call_operand.vmem [shape: f32[1,128], index: 6, kind: input, shape index: {}]   ;;  %s2146_s7 = inlined_call_operand.vmem [shape: bf16[128,128], index: 7, kind: input, shape index: {}]   ;;  %s2147_s8 = inlined_call_operand.vmem [shape: f32[1,128], index: 8, kind: input, shape index: {}]   ;;  %s2148_s9 = inlined_call_operand.vmem [shape: f32[1,128], index: 9, kind: input, shape index: {}]   ;;  %s2149_s10 = inlined_call_operand.vmem [shape: bf16[128,192], index: 10, kind: input, shape index: {}]   ;;  %s2150_s11 = inlined_call_operand.vmem [shape: f32[1,192], index: 11, kind: input, shape index: {}]   ;;  %s2151_s12 = inlined_call_operand.vmem [shape: f32[128,192], index: 12, kind: output, shape index: {}]  }
   0x1   :  { %18 = vsyncpa [#allocation5], 0  ;;  %s1540_s21 = smov [#allocation2]   ;;  %s1492_s25 = scalar_lea.hbm %s2140_s1, 2048 }
   0x2   :  { %s26_s22 = sshll.u32 %s1540_s21, 4  ;;  %p1493_p0 = scmp.ne.s32.totalorder %s2140_s1, %s1492_s25  ;;  %s27_s22 = int_to_ptr.vmem [resolvable:$true] %s26_s22 }
   0x3   :  { %p1496_p1 = scmp.lt.u32.totalorder %s1492_s25, %s2140_s1 }
   0x5   :  { %p1498_p2 = pnand %p1496_p1, %p1493_p0 }
   0x7   :  { %1501 = shalt.err (!%p1498_p2)
}
   0x8   :  { %s1502_s30 = scalar_lea.vmem %s27_s22, 2048  ;;  %p1507_p4 = scmp.lt.s32.totalorder %s27_s22, %s27_s22 }
   0x9   :  { %p1503_p3 = scmp.ne.s32.totalorder %s27_s22, %s1502_s30  ;;  %p1508_p5 = scmp.lt.s32.totalorder %s1502_s30, %s1502_s30 }
   0xb   :  { %p1509_p6 = por %p1508_p5, %p1507_p4 }
   0xd   :  { %p1510_p7 = pnand %p1509_p6, %p1503_p3 }
   0xf   :  { %1513 = shalt.err (!%p1510_p7)
}
  0x10   :  { %s1541_s13 = smov 128   ;;  %s1542_s14 = smov 8  }
  0x11   :  { %32 = dma.hbm_to_vmem [thread:$0]  %s2140_s1, 2048, %s27_s22, [#allocation3], %s1541_s13, %s1541_s13, %s1542_s14  }
  0x12   :  { %s1543_s17 = smov [#allocation4]   ;;  %s1514_s21 = scalar_lea.hbm %s2143_s4, 2048 }
  0x13   :  { %s42_s18 = sshll.u32 %s1543_s17, 4  ;;  %p1515_p8 = scmp.ne.s32.totalorder %s2143_s4, %s1514_s21  ;;  %s43_s18 = int_to_ptr.vmem [resolvable:$true] %s42_s18 }
  0x14   :  { %p1518_p9 = scmp.lt.u32.totalorder %s1514_s21, %s2143_s4 }
  0x16   :  { %p1520_p10 = pnand %p1518_p9, %p1515_p8 }
  0x18   :  { %1523 = shalt.err (!%p1520_p10)
}
  0x19   :  { %s1524_s27 = scalar_lea.vmem %s43_s18, 2048  ;;  %p1529_p12 = scmp.lt.s32.totalorder %s43_s18, %s43_s18 }
  0x1a   :  { %p1525_p11 = scmp.ne.s32.totalorder %s43_s18, %s1524_s27  ;;  %p1530_p13 = scmp.lt.s32.totalorder %s1524_s27, %s1524_s27 }
  0x1c   :  { %p1531_p0 = por %p1530_p13, %p1529_p12 }
  0x1e   :  { %p1532_p1 = pnand %p1531_p0, %p1525_p11 }
  0x20   :  { %1535 = shalt.err (!%p1532_p1)
}
  0x21   :  { %s1544_s1 = smov 64   ;;  %s1545_s22 = smov 4  }
  0x22   :  { %48 = dma.hbm_to_vmem [thread:$0]  %s2143_s4, 2048, %s43_s18, [#allocation5], %s1544_s1, %s1544_s1, %s1545_s22  }
  0x23   :  { %1536 = dma.done.wait [#allocation3], 2048  }
  0x24   :  { %1537 = vsyncadd [#allocation3], 4294965248 }
  0x25   :  { %1538 = dma.done.wait [#allocation5], 2048  }
  0x26   :  { %1539 = vsyncadd [#allocation5], 4294965248  ;;  %v1546_v0 = vmov 0   ;;  %v1420_v1 = vld [vmem:[#allocation2 + $0x4] ss:$8 sps:$4 sm:$0xff]   ;;  %v1448_v18 = vld [vmem:[#allocation4 + $0x50] sm:$0xff]   ;;  %v112_v62 = vlaneseq }
  0x27   :  { %234 = vmatprep.mubr.bf16.mxu0 %v1546_v0  ;;  %v1422_v2 = vld [vmem:[#allocation2] ss:$8 sps:$4 sm:$0xff]   ;;  %202 = vmatprep.subr.bf16.mxu0 %v1420_v1  ;;  %v1423_v3 = vld [vmem:[#allocation2 + $0x14] ss:$8 sps:$4 sm:$0xff]   ;;  %v1425_v4 = vld [vmem:[#allocation2 + $0x10] ss:$8 sps:$4 sm:$0xff]  }
  0x28   :  { %203 = vmatpush1.bf16.msra.mxu0 %v1422_v2  ;;  %v1426_v5 = vld [vmem:[#allocation2 + $0x24] ss:$8 sps:$4 sm:$0xff]   ;;  %v1428_v6 = vld [vmem:[#allocation2 + $0x20] ss:$8 sps:$4 sm:$0xff]   ;;  %v1429_v7 = vld [vmem:[#allocation2 + $0x34] ss:$8 sps:$4 sm:$0xff]  }
  0x29   :  { %204 = vmatprep.subr.bf16.mxu0 %v1423_v3  ;;  %v1431_v8 = vld [vmem:[#allocation2 + $0x30] ss:$8 sps:$4 sm:$0xff]   ;;  %v1432_v9 = vld [vmem:[#allocation2 + $0x44] ss:$8 sps:$4 sm:$0xff]   ;;  %v1434_v10 = vld [vmem:[#allocation2 + $0x40] ss:$8 sps:$4 sm:$0xff]  }
  0x2a   :  { %v1435_v11 = vld [vmem:[#allocation2 + $0x54] ss:$8 sps:$4 sm:$0xff]   ;;  %v1444_v12 = vld [vmem:[#allocation4 + $0x40] sm:$0xff]   ;;  %v1437_v13 = vld [vmem:[#allocation2 + $0x50] ss:$8 sps:$4 sm:$0xff]   ;;  %v113_v63 = vshrl.u32 %v112_v62, 7 }
  0x2b   :  { %v1445_v14 = vld [vmem:[#allocation4] sm:$0xff]   ;;  %1285 = vmatprep.subr.bf16.mxu1 %v1444_v12  ;;  %v1446_v16 = vld [vmem:[#allocation4 + $0x48] sm:$0xff]   ;;  %v1441_v20 = vld [vmem:[#allocation2 + $0x74] ss:$8 sps:$4 sm:$0xff]  }
  0x2c   :  { %205 = vmatpush1.bf16.msra.mxu0 %v1425_v4  ;;  %v1438_v15 = vld [vmem:[#allocation2 + $0x64] ss:$8 sps:$4 sm:$0xff]   ;;  %1286 = vmatpush3.bf16.msra.mxu1 %v1445_v14  ;;  %v1440_v19 = vld [vmem:[#allocation2 + $0x60] ss:$8 sps:$4 sm:$0xff]   ;;  %v1449_v21 = vld [vmem:[#allocation4 + $0x10] sm:$0xff]   ;;  %v1707_v1 = vsub.s32 0, %v113_v63 }
  0x2d   :  { %206 = vmatprep.subr.bf16.mxu0 %v1426_v5  ;;  %v1447_v17 = vld [vmem:[#allocation4 + $0x8] sm:$0xff]   ;;  %1287 = vmatprep.subr.bf16.mxu1 %v1446_v16  ;;  %v1450_v22 = vld [vmem:[#allocation4 + $0x58] sm:$0xff]   ;;  %v70_v24 = vld [vmem:[%s2139_s0] sm:$0xff]  ;;  %v1712_v3 = vsub.s32 1, %v113_v63 }
  0x2e   :  { %v1443_v23 = vld [vmem:[#allocation2 + $0x70] ss:$8 sps:$4 sm:$0xff]   ;;  %v71_v25 = vld [vmem:[%s2139_s0 + $0x8] sm:$0xff]  ;;  %v1452_v27 = vld [vmem:[#allocation4 + $0x60] sm:$0xff]  }
  0x2f   :  { %v1451_v26 = vld [vmem:[#allocation4 + $0x18] sm:$0xff]   ;;  %v1453_v28 = vld [vmem:[#allocation4 + $0x20] sm:$0xff]   ;;  %v86_v29 = vpack.c.bf16 %v71_v25, %v70_v24  ;;  %v72_v30 = vld [vmem:[%s2139_s0 + $0x10] sm:$0xff] }
  0x30   :  { %207 = vmatpush1.bf16.msra.mxu0 %v1428_v6  ;;  %1288 = vmatpush3.bf16.msra.mxu1 %v1447_v17  ;;  %v73_v31 = vld [vmem:[%s2139_s0 + $0x18] sm:$0xff]  ;;  %v74_v33 = vld [vmem:[%s2139_s0 + $0x20] sm:$0xff]  ;;  %v75_v34 = vld [vmem:[%s2139_s0 + $0x28] sm:$0xff] }
  0x31   :  { %208 = vmatprep.subr.bf16.mxu0 %v1429_v7  ;;  %1289 = vmatprep.subr.bf16.mxu1 %v1448_v18  ;;  %v87_v32 = vpack.c.bf16 %v73_v31, %v72_v30  ;;  %v88_v35 = vpack.c.bf16 %v75_v34, %v74_v33  ;;  %v76_v36 = vld [vmem:[%s2139_s0 + $0x30] sm:$0xff]  ;;  %v77_v37 = vld [vmem:[%s2139_s0 + $0x38] sm:$0xff]  ;;  %v78_v39 = vld [vmem:[%s2139_s0 + $0x40] sm:$0xff] }
  0x32   :  { %v89_v38 = vpack.c.bf16 %v77_v37, %v76_v36  ;;  %v79_v40 = vld [vmem:[%s2139_s0 + $0x48] sm:$0xff]  ;;  %v80_v42 = vld [vmem:[%s2139_s0 + $0x50] sm:$0xff]  ;;  %v81_v43 = vld [vmem:[%s2139_s0 + $0x58] sm:$0xff] }
  0x33   :  { %v90_v41 = vpack.c.bf16 %v79_v40, %v78_v39  ;;  %v91_v44 = vpack.c.bf16 %v81_v43, %v80_v42  ;;  %v82_v45 = vld [vmem:[%s2139_s0 + $0x60] sm:$0xff]  ;;  %v83_v46 = vld [vmem:[%s2139_s0 + $0x68] sm:$0xff]  ;;  %v84_v48 = vld [vmem:[%s2139_s0 + $0x70] sm:$0xff] }
  0x34   :  { %209 = vmatpush1.bf16.msra.mxu0 %v1431_v8  ;;  %1290 = vmatpush3.bf16.msra.mxu1 %v1449_v21  ;;  %v92_v47 = vpack.c.bf16 %v83_v46, %v82_v45  ;;  %v85_v49 = vld [vmem:[%s2139_s0 + $0x78] sm:$0xff]  ;;  %v1454_v51 = vld [vmem:[#allocation4 + $0x68] sm:$0xff]   ;;  %v1456_v53 = vld [vmem:[#allocation4 + $0x70] sm:$0xff]  }
  0x35   :  { %210 = vmatprep.subr.bf16.mxu0 %v1432_v9  ;;  %1291 = vmatprep.subr.bf16.mxu1 %v1450_v22  ;;  %v93_v50 = vpack.c.bf16 %v85_v49, %v84_v48  ;;  %v1455_v52 = vld [vmem:[#allocation4 + $0x28] sm:$0xff]   ;;  %v1457_v54 = vld [vmem:[#allocation4 + $0x30] sm:$0xff]   ;;  %v1458_v55 = vld [vmem:[#allocation4 + $0x78] sm:$0xff]  }
  0x36   :  { %v1459_v56 = vld [vmem:[#allocation4 + $0x38] sm:$0xff]   ;;  %v1460_v57 = vld [vmem:[%s2146_s7] sm:$0xff]   ;;  %v1461_v58 = vld [vmem:[%s2146_s7 + $0x8] sm:$0xff]  }
  0x37   :  { %v1462_v59 = vld [vmem:[%s2146_s7 + $0x10] sm:$0xff]   ;;  %v1463_v60 = vld [vmem:[%s2146_s7 + $0x18] sm:$0xff]   ;;  %v1464_v61 = vld [vmem:[%s2146_s7 + $0x20] sm:$0xff]  }
  0x38   :  { %211 = vmatpush1.bf16.msra.mxu0 %v1434_v10  ;;  %1292 = vmatpush3.bf16.msra.mxu1 %v1451_v26  ;;  %v110_v2 = vld [vmem:[%s2141_s2] sm:$0x3] }
  0x39   :  { %212 = vmatprep.subr.bf16.mxu0 %v1435_v11  ;;  %1293 = vmatprep.subr.bf16.mxu1 %v1452_v27  ;;  %v315_v4 = vld [vmem:[%s2142_s3] sm:$0x3]  ;;  %v1718_v5 = vrot.slane %v110_v2, %v1707_v1  ;;  %v1721_v6 = vrot.slane %v110_v2, %v1712_v3 }
  0x3a   :  { %v1724_v7 = vrot.slane %v315_v4, %v1707_v1  ;;  %v1727_v9 = vrot.slane %v315_v4, %v1712_v3 }
  0x3c   :  { %213 = vmatpush1.bf16.msra.mxu0 %v1437_v13  ;;  %1294 = vmatpush3.bf16.msra.mxu1 %v1453_v28 }
  0x3d   :  { %214 = vmatprep.subr.bf16.mxu0 %v1438_v15  ;;  %1295 = vmatprep.subr.bf16.mxu1 %v1454_v51 }
  0x40   :  { %215 = vmatpush1.bf16.msra.mxu0 %v1440_v19  ;;  %1296 = vmatpush3.bf16.msra.mxu1 %v1455_v52 }
  0x41   :  { %216 = vmatprep.subr.bf16.mxu0 %v1441_v20  ;;  %1297 = vmatprep.subr.bf16.mxu1 %v1456_v53 }
  0x44   :  { %217 = vmatpush1.bf16.msra.mxu0 %v1443_v23  ;;  %1298 = vmatpush3.bf16.msra.mxu1 %v1457_v54 }
  0x45   :  { %1299 = vmatprep.subr.bf16.mxu1 %v1458_v55  ;;  %1365 = vmatprep.subr.bf16.mxu0 %v1460_v57 }
  0x47   :  { %235 = vmatmul.mubr.bf16.vlgmr.msra.gmra.mrb[0].mxu0 %v86_v29 }
  0x48   :  { %244 = vmatprep.mubr.bf16.mxu0 %v1546_v0  ;;  %1300 = vmatpush3.bf16.msra.mxu1 %v1459_v56 }
  0x49   :  { %1366 = vmatpush3.bf16.msra.mxu0 %v1460_v57 }
  0x4a   :  { %1367 = vmatprep.subr.bf16.mxu0 %v1461_v58 }
  0x4d   :  { %1368 = vmatpush3.bf16.msra.mxu0 %v1461_v58 }
  0x4e   :  { %1369 = vmatprep.subr.bf16.mxu0 %v1462_v59 }
  0x4f   :  { %245 = vmatmul.mubr.bf16.gmra.mrb[4].mxu0 %v87_v32 }
  0x50   :  { %254 = vmatprep.mubr.bf16.mxu0 %v1546_v0 }
  0x51   :  { %1370 = vmatpush3.bf16.msra.mxu0 %v1462_v59 }
  0x52   :  { %1371 = vmatprep.subr.bf16.mxu0 %v1463_v60 }
  0x55   :  { %1372 = vmatpush3.bf16.msra.mxu0 %v1463_v60 }
  0x56   :  { %1373 = vmatprep.subr.bf16.mxu0 %v1464_v61 }
  0x57   :  { %255 = vmatmul.mubr.bf16.gmra.mrb[8].mxu0 %v88_v35 }
  0x58   :  { %264 = vmatprep.mubr.bf16.mxu0 %v1546_v0 }
  0x59   :  { %1374 = vmatpush3.bf16.msra.mxu0 %v1464_v61 }
  0x5f   :  { %265 = vmatmul.mubr.bf16.gmra.mrb[12].mxu0 %v89_v38 }
  0x60   :  { %274 = vmatprep.mubr.bf16.mxu0 %v1546_v0 }
  0x67   :  { %275 = vmatmul.mubr.bf16.gmra.mrb[16].mxu0 %v90_v41 }
  0x68   :  { %284 = vmatprep.mubr.bf16.mxu0 %v1546_v0 }
  0x6f   :  { %285 = vmatmul.mubr.bf16.gmra.mrb[20].mxu0 %v91_v44 }
  0x70   :  { %294 = vmatprep.mubr.bf16.mxu0 %v1546_v0 }
  0x77   :  { %295 = vmatmul.mubr.bf16.gmra.mrb[24].mxu0 %v92_v47 }
  0x78   :  { %304 = vmatprep.mubr.bf16.mxu0 %v1546_v0 }
  0x7f   :  { %305 = vmatmul.mubr.bf16.gmra.mrb[28].mxu0 %v93_v50 }
 0x11a   :  { %v236_v8 = vpop.f32.mrb[0].mxu0 }
 0x11b   :  { %v237_v10 = vadd.f32 %v236_v8, %v1718_v5  ;;  %v238_v11 = vpop.f32.mrb[1].mxu0 }
 0x11c   :  { %v239_v12 = vadd.f32 %v238_v11, %v1721_v6  ;;  %v240_v13 = vpop.f32.mrb[2].mxu0 }
 0x11d   :  { %v359_v14 = vmul.f32 %v1724_v7, %v237_v10  ;;  %v241_v15 = vadd.f32 %v240_v13, %v1718_v5  ;;  %v242_v16 = vpop.f32.mrb[3].mxu0  ;;  %vm316_vm0 = vcmp.gt.f32.partialorder %v237_v10, 0.0 }
 0x11e   :  { %v360_v17 = vmul.f32 %v1727_v9, %v239_v12  ;;  %v243_v18 = vadd.f32 %v242_v16, %v1721_v6  ;;  %vm317_vm2 = vcmp.gt.f32.partialorder %v239_v12, 0.0 }
 0x11f   :  { %vm318_vm1 = vcmp.gt.f32.partialorder %v241_v15, 0.0  ;;  %v361_v19 = vmul.f32 %v1724_v7, %v241_v15  ;;  %v391_v21 = vsel %vm316_vm0, %v237_v10, %v359_v14 }
 0x120   :  { %v362_v20 = vmul.f32 %v1727_v9, %v243_v18  ;;  %vm319_vm3 = vcmp.gt.f32.partialorder %v243_v18, 0.0  ;;  %v392_v24 = vsel %vm317_vm2, %v239_v12, %v360_v17 }
 0x121   :  { %v393_v22 = vsel %vm318_vm1, %v241_v15, %v361_v19 }
 0x122   :  { %v246_v23 = vpop.f32.mrb[4].mxu0  ;;  %v394_v25 = vsel %vm319_vm3, %v243_v18, %v362_v20  ;;  %v423_v26 = vpack.c.bf16 %v393_v22, %v391_v21 }
 0x123   :  { %v247_v27 = vadd.f32 %v246_v23, %v1718_v5  ;;  %v248_v28 = vpop.f32.mrb[5].mxu0  ;;  %v424_v29 = vpack.c.bf16 %v394_v25, %v392_v24 }
 0x124   :  { %v249_v30 = vadd.f32 %v248_v28, %v1721_v6  ;;  %v250_v31 = vpop.f32.mrb[6].mxu0 }
 0x125   :  { %v363_v32 = vmul.f32 %v1724_v7, %v247_v27  ;;  %v251_v33 = vadd.f32 %v250_v31, %v1718_v5  ;;  %v252_v34 = vpop.f32.mrb[7].mxu0  ;;  %606 = vmatprep.mubr.bf16.mxu1 %v424_v29  ;;  %vm320_vm4 = vcmp.gt.f32.partialorder %v247_v27, 0.0 }
 0x126   :  { %v364_v35 = vmul.f32 %v1727_v9, %v249_v30  ;;  %v253_v36 = vadd.f32 %v252_v34, %v1721_v6  ;;  %607 = vmatmul.mubr.bf16.vlgmr.msra.gmra.mrb[0].mxu1 %v423_v26  ;;  %vm321_vm5 = vcmp.gt.f32.partialorder %v249_v30, 0.0 }
 0x127   :  { %vm322_vm6 = vcmp.gt.f32.partialorder %v251_v33, 0.0  ;;  %v365_v37 = vmul.f32 %v1724_v7, %v251_v33  ;;  %v395_v39 = vsel %vm320_vm4, %v247_v27, %v363_v32 }
 0x128   :  { %vm323_vm7 = vcmp.gt.f32.partialorder %v253_v36, 0.0  ;;  %v366_v38 = vmul.f32 %v1727_v9, %v253_v36  ;;  %v396_v42 = vsel %vm321_vm5, %v249_v30, %v364_v35 }
 0x129   :  { %v397_v40 = vsel %vm322_vm6, %v251_v33, %v365_v37 }
 0x12a   :  { %v256_v41 = vpop.f32.mrb[8].mxu0  ;;  %v398_v43 = vsel %vm323_vm7, %v253_v36, %v366_v38  ;;  %v425_v44 = vpack.c.bf16 %v397_v40, %v395_v39 }
 0x12b   :  { %v257_v45 = vadd.f32 %v256_v41, %v1718_v5  ;;  %v258_v46 = vpop.f32.mrb[9].mxu0  ;;  %v426_v47 = vpack.c.bf16 %v398_v43, %v396_v42 }
 0x12c   :  { %v259_v48 = vadd.f32 %v258_v46, %v1721_v6  ;;  %v260_v49 = vpop.f32.mrb[10].mxu0 }
 0x12d   :  { %v367_v50 = vmul.f32 %v1724_v7, %v257_v45  ;;  %v261_v51 = vadd.f32 %v260_v49, %v1718_v5  ;;  %v262_v52 = vpop.f32.mrb[11].mxu0  ;;  %614 = vmatprep.mubr.bf16.mxu1 %v426_v47  ;;  %vm324_vm8 = vcmp.gt.f32.partialorder %v257_v45, 0.0 }
 0x12e   :  { %v368_v53 = vmul.f32 %v1727_v9, %v259_v48  ;;  %v263_v54 = vadd.f32 %v262_v52, %v1721_v6  ;;  %615 = vmatmul.mubr.bf16.gmra.mrb[4].mxu1 %v425_v44  ;;  %vm325_vm9 = vcmp.gt.f32.partialorder %v259_v48, 0.0 }
 0x12f   :  { %vm326_vm10 = vcmp.gt.f32.partialorder %v261_v51, 0.0  ;;  %v369_v55 = vmul.f32 %v1724_v7, %v261_v51  ;;  %v399_v57 = vsel %vm324_vm8, %v257_v45, %v367_v50 }
 0x130   :  { %vm327_vm11 = vcmp.gt.f32.partialorder %v263_v54, 0.0  ;;  %v370_v56 = vmul.f32 %v1727_v9, %v263_v54  ;;  %v400_v60 = vsel %vm325_vm9, %v259_v48, %v368_v53 }
 0x131   :  { %v401_v58 = vsel %vm326_vm10, %v261_v51, %v369_v55 }
 0x132   :  { %v266_v59 = vpop.f32.mrb[12].mxu0  ;;  %v402_v61 = vsel %vm327_vm11, %v263_v54, %v370_v56  ;;  %v427_v62 = vpack.c.bf16 %v401_v58, %v399_v57 }
 0x133   :  { %v267_v63 = vadd.f32 %v266_v59, %v1718_v5  ;;  %v268_v2 = vpop.f32.mrb[13].mxu0  ;;  %v428_v4 = vpack.c.bf16 %v402_v61, %v400_v60 }
 0x134   :  { %v269_v8 = vadd.f32 %v268_v2, %v1721_v6  ;;  %v270_v10 = vpop.f32.mrb[14].mxu0 }
 0x135   :  { %v371_v11 = vmul.f32 %v1724_v7, %v267_v63  ;;  %v271_v12 = vadd.f32 %v270_v10, %v1718_v5  ;;  %v272_v13 = vpop.f32.mrb[15].mxu0  ;;  %622 = vmatprep.mubr.bf16.mxu1 %v428_v4  ;;  %vm328_vm12 = vcmp.gt.f32.partialorder %v267_v63, 0.0 }
 0x136   :  { %v372_v14 = vmul.f32 %v1727_v9, %v269_v8  ;;  %v273_v15 = vadd.f32 %v272_v13, %v1721_v6  ;;  %623 = vmatmul.mubr.bf16.gmra.mrb[8].mxu1 %v427_v62  ;;  %vm329_vm13 = vcmp.gt.f32.partialorder %v269_v8, 0.0 }
 0x137   :  { %vm330_vm14 = vcmp.gt.f32.partialorder %v271_v12, 0.0  ;;  %v373_v16 = vmul.f32 %v1724_v7, %v271_v12  ;;  %v403_v18 = vsel %vm328_vm12, %v267_v63, %v371_v11 }
 0x138   :  { %vm331_vm15 = vcmp.gt.f32.partialorder %v273_v15, 0.0  ;;  %v374_v17 = vmul.f32 %v1727_v9, %v273_v15  ;;  %v404_v21 = vsel %vm329_vm13, %v269_v8, %v372_v14 }
 0x139   :  { %v405_v19 = vsel %vm330_vm14, %v271_v12, %v373_v16 }
 0x13a   :  { %v276_v20 = vpop.f32.mrb[16].mxu0  ;;  %v406_v22 = vsel %vm331_vm15, %v273_v15, %v374_v17  ;;  %v429_v23 = vpack.c.bf16 %v405_v19, %v403_v18 }
 0x13b   :  { %v277_v24 = vadd.f32 %v276_v20, %v1718_v5  ;;  %v278_v25 = vpop.f32.mrb[17].mxu0  ;;  %v430_v26 = vpack.c.bf16 %v406_v22, %v404_v21 }
 0x13c   :  { %v279_v27 = vadd.f32 %v278_v25, %v1721_v6  ;;  %v280_v28 = vpop.f32.mrb[18].mxu0 }
 0x13d   :  { %v375_v29 = vmul.f32 %v1724_v7, %v277_v24  ;;  %v281_v30 = vadd.f32 %v280_v28, %v1718_v5  ;;  %v282_v31 = vpop.f32.mrb[19].mxu0  ;;  %630 = vmatprep.mubr.bf16.mxu1 %v430_v26  ;;  %vm332_vm0 = vcmp.gt.f32.partialorder %v277_v24, 0.0 }
 0x13e   :  { %v376_v32 = vmul.f32 %v1727_v9, %v279_v27  ;;  %v283_v33 = vadd.f32 %v282_v31, %v1721_v6  ;;  %631 = vmatmul.mubr.bf16.gmra.mrb[12].mxu1 %v429_v23  ;;  %vm333_vm1 = vcmp.gt.f32.partialorder %v279_v27, 0.0 }
 0x13f   :  { %vm334_vm2 = vcmp.gt.f32.partialorder %v281_v30, 0.0  ;;  %v377_v34 = vmul.f32 %v1724_v7, %v281_v30  ;;  %v407_v36 = vsel %vm332_vm0, %v277_v24, %v375_v29 }
 0x140   :  { %vm335_vm3 = vcmp.gt.f32.partialorder %v283_v33, 0.0  ;;  %v378_v35 = vmul.f32 %v1727_v9, %v283_v33  ;;  %v408_v39 = vsel %vm333_vm1, %v279_v27, %v376_v32 }
 0x141   :  { %v409_v37 = vsel %vm334_vm2, %v281_v30, %v377_v34 }
 0x142   :  { %v286_v38 = vpop.f32.mrb[20].mxu0  ;;  %v410_v40 = vsel %vm335_vm3, %v283_v33, %v378_v35  ;;  %v431_v41 = vpack.c.bf16 %v409_v37, %v407_v36 }
 0x143   :  { %v287_v42 = vadd.f32 %v286_v38, %v1718_v5  ;;  %v288_v43 = vpop.f32.mrb[21].mxu0  ;;  %v432_v44 = vpack.c.bf16 %v410_v40, %v408_v39  ;;  %v1470_v38 = vld [vmem:[%s2149_s10 + $0x4] ss:$8 sps:$4 sm:$0xff]   ;;  %v1809_v39 = vld [vmem:[%s2149_s10] ss:$8 sps:$4 sm:$0xff]  }
 0x144   :  { %v289_v45 = vadd.f32 %v288_v43, %v1721_v6  ;;  %v290_v46 = vpop.f32.mrb[22].mxu0  ;;  %1397 = vmatprep.subr.bf16.mxu1 %v1470_v38  ;;  %v1814_v40 = vld [vmem:[%s2149_s10 + $0x14] ss:$8 sps:$4 sm:$0xff]   ;;  %v1833_v43 = vld [vmem:[%s2149_s10 + $0x20] ss:$8 sps:$4 sm:$0xff]  }
 0x145   :  { %v379_v47 = vmul.f32 %v1724_v7, %v287_v42  ;;  %v291_v48 = vadd.f32 %v290_v46, %v1718_v5  ;;  %v292_v49 = vpop.f32.mrb[23].mxu0  ;;  %638 = vmatprep.mubr.bf16.mxu1 %v432_v44  ;;  %vm336_vm4 = vcmp.gt.f32.partialorder %v287_v42, 0.0  ;;  %1405 = vmatpush1.bf16.msra.mxu1 %v1809_v39  ;;  %v1838_v44 = vld [vmem:[%s2149_s10 + $0x34] ss:$8 sps:$4 sm:$0xff]   ;;  %v1850_v46 = vld [vmem:[%s2149_s10 + $0x44] ss:$8 sps:$4 sm:$0xff]  }
 0x146   :  { %v380_v50 = vmul.f32 %v1727_v9, %v289_v45  ;;  %v293_v51 = vadd.f32 %v292_v49, %v1721_v6  ;;  %639 = vmatmul.mubr.bf16.gmra.mrb[16].mxu1 %v431_v41  ;;  %vm337_vm5 = vcmp.gt.f32.partialorder %v289_v45, 0.0  ;;  %1398 = vmatprep.subr.bf16.mxu1 %v1814_v40  ;;  %v1821_v41 = vld [vmem:[%s2149_s10 + $0x10] ss:$8 sps:$4 sm:$0xff]  }
 0x147   :  { %vm338_vm6 = vcmp.gt.f32.partialorder %v291_v48, 0.0  ;;  %v381_v52 = vmul.f32 %v1724_v7, %v291_v48  ;;  %v411_v54 = vsel %vm336_vm4, %v287_v42, %v379_v47  ;;  %v1826_v42 = vld [vmem:[%s2149_s10 + $0x24] ss:$8 sps:$4 sm:$0xff]   ;;  %v1857_v47 = vld [vmem:[%s2149_s10 + $0x40] ss:$8 sps:$4 sm:$0xff]  }
 0x148   :  { %vm339_vm7 = vcmp.gt.f32.partialorder %v293_v51, 0.0  ;;  %v382_v53 = vmul.f32 %v1727_v9, %v293_v51  ;;  %v412_v57 = vsel %vm337_vm5, %v289_v45, %v380_v50  ;;  %v1845_v45 = vld [vmem:[%s2149_s10 + $0x30] ss:$8 sps:$4 sm:$0xff]  }
 0x149   :  { %v413_v55 = vsel %vm338_vm6, %v291_v48, %v381_v52  ;;  %1406 = vmatpush1.bf16.msra.mxu1 %v1821_v41  ;;  %v1862_v48 = vld [vmem:[%s2149_s10 + $0x54] ss:$8 sps:$4 sm:$0xff]   ;;  %v1869_v49 = vld [vmem:[%s2149_s10 + $0x50] ss:$8 sps:$4 sm:$0xff]  }
 0x14a   :  { %v296_v56 = vpop.f32.mrb[24].mxu0  ;;  %v414_v58 = vsel %vm339_vm7, %v293_v51, %v382_v53  ;;  %v433_v59 = vpack.c.bf16 %v413_v55, %v411_v54  ;;  %1399 = vmatprep.subr.bf16.mxu1 %v1826_v42  ;;  %v1875_v51 = vld [vmem:[%s2144_s5] ss:$0 sm:$0xff] }
 0x14b   :  { %v297_v60 = vadd.f32 %v296_v56, %v1718_v5  ;;  %v298_v61 = vpop.f32.mrb[25].mxu0  ;;  %v434_v62 = vpack.c.bf16 %v414_v58, %v412_v57  ;;  %v1880_v55 = vld [vmem:[%s2145_s6] ss:$0 sm:$0xff] }
 0x14c   :  { %v299_v63 = vadd.f32 %v298_v61, %v1721_v6  ;;  %v300_v2 = vpop.f32.mrb[26].mxu0 }
 0x14d   :  { %v383_v4 = vmul.f32 %v1724_v7, %v297_v60  ;;  %v301_v8 = vadd.f32 %v300_v2, %v1718_v5  ;;  %v302_v10 = vpop.f32.mrb[27].mxu0  ;;  %646 = vmatprep.mubr.bf16.mxu1 %v434_v62  ;;  %vm340_vm8 = vcmp.gt.f32.partialorder %v297_v60, 0.0  ;;  %1407 = vmatpush1.bf16.msra.mxu1 %v1833_v43 }
 0x14e   :  { %v384_v11 = vmul.f32 %v1727_v9, %v299_v63  ;;  %v303_v12 = vadd.f32 %v302_v10, %v1721_v6  ;;  %647 = vmatmul.mubr.bf16.gmra.mrb[20].mxu1 %v433_v59  ;;  %vm341_vm9 = vcmp.gt.f32.partialorder %v299_v63, 0.0  ;;  %1400 = vmatprep.subr.bf16.mxu1 %v1838_v44 }
 0x14f   :  { %vm342_vm10 = vcmp.gt.f32.partialorder %v301_v8, 0.0  ;;  %v385_v13 = vmul.f32 %v1724_v7, %v301_v8  ;;  %v415_v15 = vsel %vm340_vm8, %v297_v60, %v383_v4 }
 0x150   :  { %vm343_vm11 = vcmp.gt.f32.partialorder %v303_v12, 0.0  ;;  %v386_v14 = vmul.f32 %v1727_v9, %v303_v12  ;;  %v416_v18 = vsel %vm341_vm9, %v299_v63, %v384_v11 }
 0x151   :  { %v417_v16 = vsel %vm342_vm10, %v301_v8, %v385_v13  ;;  %1408 = vmatpush1.bf16.msra.mxu1 %v1845_v45 }
 0x152   :  { %v306_v17 = vpop.f32.mrb[28].mxu0  ;;  %v418_v19 = vsel %vm343_vm11, %v303_v12, %v386_v14  ;;  %v435_v20 = vpack.c.bf16 %v417_v16, %v415_v15  ;;  %1401 = vmatprep.subr.bf16.mxu1 %v1850_v46 }
 0x153   :  { %v307_v21 = vadd.f32 %v306_v17, %v1718_v5  ;;  %v308_v22 = vpop.f32.mrb[29].mxu0  ;;  %v436_v23 = vpack.c.bf16 %v418_v19, %v416_v18 }
 0x154   :  { %v309_v24 = vadd.f32 %v308_v22, %v1721_v6  ;;  %v310_v25 = vpop.f32.mrb[30].mxu0 }
 0x155   :  { %v387_v26 = vmul.f32 %v1724_v7, %v307_v21  ;;  %v311_v27 = vadd.f32 %v310_v25, %v1718_v5  ;;  %v312_v28 = vpop.f32.mrb[31].mxu0  ;;  %654 = vmatprep.mubr.bf16.mxu1 %v436_v23  ;;  %vm344_vm12 = vcmp.gt.f32.partialorder %v307_v21, 0.0  ;;  %1409 = vmatpush1.bf16.msra.mxu1 %v1857_v47 }
 0x156   :  { %v388_v29 = vmul.f32 %v1727_v9, %v309_v24  ;;  %v313_v30 = vadd.f32 %v312_v28, %v1721_v6  ;;  %655 = vmatmul.mubr.bf16.gmra.mrb[24].mxu1 %v435_v20  ;;  %vm345_vm13 = vcmp.gt.f32.partialorder %v309_v24, 0.0  ;;  %v1465_v6 = vld [vmem:[%s2146_s7 + $0x28] sm:$0xff]   ;;  %1402 = vmatprep.subr.bf16.mxu1 %v1862_v48 }
 0x157   :  { %vm346_vm14 = vcmp.gt.f32.partialorder %v311_v27, 0.0  ;;  %v389_v31 = vmul.f32 %v1724_v7, %v311_v27  ;;  %v419_v33 = vsel %vm344_vm12, %v307_v21, %v387_v26  ;;  %1375 = vmatprep.subr.bf16.mxu0 %v1465_v6  ;;  %v1466_v7 = vld [vmem:[%s2146_s7 + $0x30] sm:$0xff]  }
 0x158   :  { %vm347_vm15 = vcmp.gt.f32.partialorder %v313_v30, 0.0  ;;  %v390_v32 = vmul.f32 %v1727_v9, %v313_v30  ;;  %v420_v35 = vsel %vm345_vm13, %v309_v24, %v388_v29  ;;  %1376 = vmatpush3.bf16.msra.mxu0 %v1465_v6  ;;  %v1467_v9 = vld [vmem:[%s2146_s7 + $0x38] sm:$0xff]  }
 0x159   :  { %v421_v34 = vsel %vm346_vm14, %v311_v27, %v389_v31  ;;  %1377 = vmatprep.subr.bf16.mxu0 %v1466_v7  ;;  %1410 = vmatpush1.bf16.msra.mxu1 %v1869_v49 }
 0x15a   :  { %v422_v36 = vsel %vm347_vm15, %v313_v30, %v390_v32  ;;  %v437_v5 = vpack.c.bf16 %v421_v34, %v419_v33 }
 0x15b   :  { %v438_v37 = vpack.c.bf16 %v422_v36, %v420_v35 }
 0x15c   :  { %1378 = vmatpush3.bf16.msra.mxu0 %v1466_v7 }
 0x15d   :  { %662 = vmatprep.mubr.bf16.mxu1 %v438_v37  ;;  %1379 = vmatprep.subr.bf16.mxu0 %v1467_v9 }
 0x15e   :  { %663 = vmatmul.mubr.bf16.gmra.mrb[28].mxu1 %v437_v5 }
 0x15f   :  { %1125 = vmatprep.mubr.bf16.mxu1 %v1546_v0 }
 0x160   :  { %1380 = vmatpush3.bf16.msra.mxu0 %v1467_v9 }
 0x161   :  { %1073 = vmatprep.subr.bf16.mxu0 %v1470_v38 }
 0x1f9   :  { %v1301_v50 = vpop.f32.mrb[0].mxu1 }
 0x1fa   :  { %v1302_v52 = vpop.f32.mrb[1].mxu1 }
 0x1fb   :  { %v1303_v53 = vadd.f32 %v1302_v52, %v1301_v50  ;;  %v1304_v54 = vpop.f32.mrb[2].mxu1 }
 0x1fc   :  { %v1305_v56 = vpop.f32.mrb[3].mxu1 }
 0x1fd   :  { %v609_v57 = vadd.f32 %v1303_v53, %v1875_v51  ;;  %v1306_v58 = vadd.f32 %v1305_v56, %v1304_v54 }
 0x1ff   :  { %v694_v59 = vmul.f32 %v1880_v55, %v609_v57  ;;  %v612_v60 = vadd.f32 %v1306_v58, %v1875_v51  ;;  %vm672_vm0 = vcmp.gt.f32.partialorder %v609_v57, 0.0 }
 0x201   :  { %vm673_vm1 = vcmp.gt.f32.partialorder %v612_v60, 0.0  ;;  %v695_v61 = vmul.f32 %v1880_v55, %v612_v60  ;;  %v1307_v62 = vpop.f32.mrb[4].mxu1  ;;  %v710_v8 = vsel %vm672_vm0, %v609_v57, %v694_v59 }
 0x202   :  { %v1308_v63 = vpop.f32.mrb[5].mxu1 }
 0x203   :  { %v1309_v2 = vadd.f32 %v1308_v63, %v1307_v62  ;;  %v1310_v4 = vpop.f32.mrb[6].mxu1  ;;  %v711_v10 = vsel %vm673_vm1, %v612_v60, %v695_v61 }
 0x204   :  { %v1311_v11 = vpop.f32.mrb[7].mxu1  ;;  %v726_v12 = vpack.c.bf16 %v711_v10, %v710_v8 }
 0x205   :  { %v617_v13 = vadd.f32 %v1309_v2, %v1875_v51  ;;  %v1312_v14 = vadd.f32 %v1311_v11, %v1310_v4 }
 0x206   :  { %1381 = vmatprep.mubr.bf16.mxu0 %v726_v12 }
 0x207   :  { %v696_v15 = vmul.f32 %v1880_v55, %v617_v13  ;;  %v620_v16 = vadd.f32 %v1312_v14, %v1875_v51  ;;  %vm674_vm2 = vcmp.gt.f32.partialorder %v617_v13, 0.0 }
 0x209   :  { %vm675_vm3 = vcmp.gt.f32.partialorder %v620_v16, 0.0  ;;  %v697_v17 = vmul.f32 %v1880_v55, %v620_v16  ;;  %v1313_v18 = vpop.f32.mrb[8].mxu1  ;;  %v712_v20 = vsel %vm674_vm2, %v617_v13, %v696_v15 }
 0x20a   :  { %v1314_v19 = vpop.f32.mrb[9].mxu1 }
 0x20b   :  { %v713_v21 = vsel %vm675_vm3, %v620_v16, %v697_v17  ;;  %v1315_v22 = vadd.f32 %v1314_v19, %v1313_v18  ;;  %v1316_v23 = vpop.f32.mrb[10].mxu1 }
 0x20c   :  { %v727_v24 = vpack.c.bf16 %v713_v21, %v712_v20  ;;  %v1317_v25 = vpop.f32.mrb[11].mxu1 }
 0x20d   :  { %v625_v26 = vadd.f32 %v1315_v22, %v1875_v51  ;;  %v1318_v27 = vadd.f32 %v1317_v25, %v1316_v23 }
 0x20e   :  { %1382 = vmatmul.mubr.bf16.vlgmr.msra.gmra.mrb[32].mxu0 %v727_v24 }
 0x20f   :  { %v698_v28 = vmul.f32 %v1880_v55, %v625_v26  ;;  %v628_v29 = vadd.f32 %v1318_v27, %v1875_v51  ;;  %1074 = vmatpush1.bf16.msra.mxu0 %v1809_v39  ;;  %vm676_vm4 = vcmp.gt.f32.partialorder %v625_v26, 0.0 }
 0x210   :  { %1075 = vmatprep.subr.bf16.mxu0 %v1814_v40 }
 0x211   :  { %vm677_vm5 = vcmp.gt.f32.partialorder %v628_v29, 0.0  ;;  %v699_v30 = vmul.f32 %v1880_v55, %v628_v29  ;;  %v1319_v31 = vpop.f32.mrb[12].mxu1  ;;  %v714_v35 = vsel %vm676_vm4, %v625_v26, %v698_v28 }
 0x212   :  { %v1320_v32 = vpop.f32.mrb[13].mxu1 }
 0x213   :  { %v1321_v33 = vadd.f32 %v1320_v32, %v1319_v31  ;;  %v1322_v34 = vpop.f32.mrb[14].mxu1  ;;  %v715_v36 = vsel %vm677_vm5, %v628_v29, %v699_v30  ;;  %1076 = vmatpush1.bf16.msra.mxu0 %v1821_v41 }
 0x214   :  { %v1323_v5 = vpop.f32.mrb[15].mxu1  ;;  %v728_v37 = vpack.c.bf16 %v715_v36, %v714_v35  ;;  %1077 = vmatprep.subr.bf16.mxu0 %v1826_v42 }
 0x215   :  { %v633_v6 = vadd.f32 %v1321_v33, %v1875_v51  ;;  %v1324_v7 = vadd.f32 %v1323_v5, %v1322_v34 }
 0x216   :  { %1385 = vmatprep.mubr.bf16.mxu0 %v728_v37 }
 0x217   :  { %v700_v9 = vmul.f32 %v1880_v55, %v633_v6  ;;  %v636_v38 = vadd.f32 %v1324_v7, %v1875_v51  ;;  %1078 = vmatpush1.bf16.msra.mxu0 %v1833_v43  ;;  %vm678_vm6 = vcmp.gt.f32.partialorder %v633_v6, 0.0  ;;  %v1488_v7 = vld [vmem:[%s2149_s10 + $0x64] ss:$8 sps:$4 sm:$0xff]  }
 0x218   :  { %1079 = vmatprep.subr.bf16.mxu0 %v1838_v44  ;;  %1403 = vmatprep.subr.bf16.mxu1 %v1488_v7 }
 0x219   :  { %vm679_vm7 = vcmp.gt.f32.partialorder %v636_v38, 0.0  ;;  %v701_v39 = vmul.f32 %v1880_v55, %v636_v38  ;;  %v1325_v40 = vpop.f32.mrb[16].mxu1  ;;  %v716_v52 = vsel %vm678_vm6, %v633_v6, %v700_v9  ;;  %v1486_v9 = vld [vmem:[%s2149_s10 + $0x60] ss:$8 sps:$4 sm:$0xff]  }
 0x21a   :  { %v1326_v41 = vpop.f32.mrb[17].mxu1  ;;  %1411 = vmatpush1.bf16.msra.mxu1 %v1486_v9 }
 0x21b   :  { %v1327_v50 = vadd.f32 %v1326_v41, %v1325_v40  ;;  %v1328_v42 = vpop.f32.mrb[18].mxu1  ;;  %v717_v53 = vsel %vm679_vm7, %v636_v38, %v701_v39  ;;  %1080 = vmatpush1.bf16.msra.mxu0 %v1845_v45  ;;  %v1941_v38 = vld [vmem:[%s2147_s8] ss:$0 sm:$0xff] }
 0x21c   :  { %v1329_v54 = vpop.f32.mrb[19].mxu1  ;;  %v729_v56 = vpack.c.bf16 %v717_v53, %v716_v52  ;;  %1081 = vmatprep.subr.bf16.mxu0 %v1850_v46  ;;  %v1946_v40 = vld [vmem:[%s2148_s9] ss:$0 sm:$0xff] }
 0x21d   :  { %v641_v43 = vadd.f32 %v1327_v50, %v1875_v51  ;;  %v1330_v57 = vadd.f32 %v1329_v54, %v1328_v42 }
 0x21e   :  { %1386 = vmatmul.mubr.bf16.gmra.mrb[36].mxu0 %v729_v56 }
 0x21f   :  { %v702_v44 = vmul.f32 %v1880_v55, %v641_v43  ;;  %v644_v58 = vadd.f32 %v1330_v57, %v1875_v51  ;;  %1082 = vmatpush1.bf16.msra.mxu0 %v1857_v47  ;;  %vm680_vm8 = vcmp.gt.f32.partialorder %v641_v43, 0.0 }
 0x220   :  { %1083 = vmatprep.subr.bf16.mxu0 %v1862_v48 }
 0x221   :  { %vm681_vm9 = vcmp.gt.f32.partialorder %v644_v58, 0.0  ;;  %v703_v45 = vmul.f32 %v1880_v55, %v644_v58  ;;  %v1331_v59 = vpop.f32.mrb[20].mxu1  ;;  %v718_v62 = vsel %vm680_vm8, %v641_v43, %v702_v44 }
 0x222   :  { %v1332_v60 = vpop.f32.mrb[21].mxu1 }
 0x223   :  { %v1333_v61 = vadd.f32 %v1332_v60, %v1331_v59  ;;  %v1334_v46 = vpop.f32.mrb[22].mxu1  ;;  %v719_v63 = vsel %vm681_vm9, %v644_v58, %v703_v45  ;;  %1084 = vmatpush1.bf16.msra.mxu0 %v1869_v49 }
 0x224   :  { %v1335_v2 = vpop.f32.mrb[23].mxu1  ;;  %v730_v4 = vpack.c.bf16 %v719_v63, %v718_v62  ;;  %1085 = vmatprep.subr.bf16.mxu0 %v1488_v7 }
 0x225   :  { %v649_v8 = vadd.f32 %v1333_v61, %v1875_v51  ;;  %v1336_v10 = vadd.f32 %v1335_v2, %v1334_v46 }
 0x226   :  { %1389 = vmatprep.mubr.bf16.mxu0 %v730_v4 }
 0x227   :  { %v704_v47 = vmul.f32 %v1880_v55, %v649_v8  ;;  %v652_v48 = vadd.f32 %v1336_v10, %v1875_v51  ;;  %vm682_vm10 = vcmp.gt.f32.partialorder %v649_v8, 0.0  ;;  %1086 = vmatpush1.bf16.msra.mxu0 %v1486_v9 }
 0x229   :  { %vm683_vm11 = vcmp.gt.f32.partialorder %v652_v48, 0.0  ;;  %v705_v11 = vmul.f32 %v1880_v55, %v652_v48  ;;  %v1337_v12 = vpop.f32.mrb[24].mxu1  ;;  %v720_v16 = vsel %vm682_vm10, %v649_v8, %v704_v47 }
 0x22a   :  { %v1338_v13 = vpop.f32.mrb[25].mxu1 }
 0x22b   :  { %v1339_v14 = vadd.f32 %v1338_v13, %v1337_v12  ;;  %v1340_v15 = vpop.f32.mrb[26].mxu1  ;;  %v721_v49 = vsel %vm683_vm11, %v652_v48, %v705_v11 }
 0x22c   :  { %v1341_v17 = vpop.f32.mrb[27].mxu1  ;;  %v731_v18 = vpack.c.bf16 %v721_v49, %v720_v16 }
 0x22d   :  { %v657_v19 = vadd.f32 %v1339_v14, %v1875_v51  ;;  %v1342_v20 = vadd.f32 %v1341_v17, %v1340_v15 }
 0x22e   :  { %1390 = vmatmul.mubr.bf16.gmra.mrb[40].mxu0 %v731_v18 }
 0x22f   :  { %v706_v21 = vmul.f32 %v1880_v55, %v657_v19  ;;  %v660_v22 = vadd.f32 %v1342_v20, %v1875_v51  ;;  %vm684_vm12 = vcmp.gt.f32.partialorder %v657_v19, 0.0 }
 0x231   :  { %vm685_vm13 = vcmp.gt.f32.partialorder %v660_v22, 0.0  ;;  %v707_v23 = vmul.f32 %v1880_v55, %v660_v22  ;;  %v1343_v24 = vpop.f32.mrb[28].mxu1  ;;  %v722_v28 = vsel %vm684_vm12, %v657_v19, %v706_v21 }
 0x232   :  { %v1344_v25 = vpop.f32.mrb[29].mxu1 }
 0x233   :  { %v1345_v26 = vadd.f32 %v1344_v25, %v1343_v24  ;;  %v1346_v27 = vpop.f32.mrb[30].mxu1  ;;  %v723_v29 = vsel %vm685_vm13, %v660_v22, %v707_v23 }
 0x234   :  { %v1347_v30 = vpop.f32.mrb[31].mxu1  ;;  %v732_v31 = vpack.c.bf16 %v723_v29, %v722_v28 }
 0x235   :  { %v665_v32 = vadd.f32 %v1345_v26, %v1875_v51  ;;  %v1348_v33 = vadd.f32 %v1347_v30, %v1346_v27 }
 0x236   :  { %1393 = vmatprep.mubr.bf16.mxu0 %v732_v31 }
 0x237   :  { %v708_v34 = vmul.f32 %v1880_v55, %v665_v32  ;;  %v668_v35 = vadd.f32 %v1348_v33, %v1875_v51  ;;  %vm686_vm14 = vcmp.gt.f32.partialorder %v665_v32, 0.0  ;;  %v1491_v51 = vld [vmem:[%s2149_s10 + $0x74] ss:$8 sps:$4 sm:$0xff]  }
 0x238   :  { %1087 = vmatprep.subr.bf16.mxu0 %v1491_v51  ;;  %1404 = vmatprep.subr.bf16.mxu1 %v1491_v51 }
 0x239   :  { %vm687_vm15 = vcmp.gt.f32.partialorder %v668_v35, 0.0  ;;  %v709_v36 = vmul.f32 %v1880_v55, %v668_v35  ;;  %v724_v5 = vsel %vm686_vm14, %v665_v32, %v708_v34  ;;  %v1489_v55 = vld [vmem:[%s2149_s10 + $0x70] ss:$8 sps:$4 sm:$0xff]  }
 0x23a   :  { %1088 = vmatpush1.bf16.msra.mxu0 %v1489_v55  ;;  %1412 = vmatpush1.bf16.msra.mxu1 %v1489_v55 }
 0x23b   :  { %v725_v37 = vsel %vm687_vm15, %v668_v35, %v709_v36 }
 0x23c   :  { %v733_v6 = vpack.c.bf16 %v725_v37, %v724_v5 }
 0x23e   :  { %1394 = vmatmul.mubr.bf16.gmra.mrb[44].mxu0 %v733_v6 }
 0x23f   :  { %1105 = vmatprep.mubr.bf16.mxu0 %v1546_v0 }
 0x2e1   :  { %v1383_v39 = vpop.f32.mrb[32].mxu0 }
 0x2e2   :  { %v848_v41 = vadd.f32 %v1383_v39, %v1941_v38  ;;  %v839_v50 = vpop.f32.mrb[33].mxu0 }
 0x2e3   :  { %v840_v42 = vadd.f32 %v1941_v38, %v839_v50  ;;  %v1384_v52 = vpop.f32.mrb[34].mxu0 }
 0x2e4   :  { %v927_v53 = vmul.f32 %v1946_v40, %v848_v41  ;;  %v851_v54 = vadd.f32 %v1384_v52, %v1941_v38  ;;  %v842_v56 = vpop.f32.mrb[35].mxu0  ;;  %vm905_vm0 = vcmp.gt.f32.partialorder %v848_v41, 0.0 }
 0x2e5   :  { %v925_v43 = vmul.f32 %v1946_v40, %v840_v42  ;;  %v843_v57 = vadd.f32 %v1941_v38, %v842_v56  ;;  %vm903_vm1 = vcmp.gt.f32.partialorder %v840_v42, 0.0 }
 0x2e6   :  { %vm906_vm2 = vcmp.gt.f32.partialorder %v851_v54, 0.0  ;;  %v928_v44 = vmul.f32 %v1946_v40, %v851_v54  ;;  %v943_v45 = vsel %vm905_vm0, %v848_v41, %v927_v53  ;;  %vm1187_vm0 = vcmask 523264  }
 0x2e7   :  { %vm904_vm3 = vcmp.gt.f32.partialorder %v843_v57, 0.0  ;;  %v926_v58 = vmul.f32 %v1946_v40, %v843_v57  ;;  %v941_v60 = vsel %vm903_vm1, %v840_v42, %v925_v43 }
 0x2e8   :  { %v944_v59 = vsel %vm906_vm2, %v851_v54, %v928_v44 }
 0x2e9   :  { %v942_v61 = vsel %vm904_vm3, %v843_v57, %v926_v58  ;;  %v958_v46 = vpack.c.bf16 %v944_v59, %v943_v45 }
 0x2ea   :  { %v957_v62 = vpack.c.bf16 %v942_v61, %v941_v60 }
 0x2ec   :  { %1106 = vmatmul.mubr.bf16.vlgmr.msra.gmra.mrb[48].mxu0 %v957_v62 }
 0x2ed   :  { %1115 = vmatprep.mubr.bf16.mxu0 %v1546_v0 }
 0x2f1   :  { %v1387_v63 = vpop.f32.mrb[36].mxu0 }
 0x2f2   :  { %v864_v2 = vadd.f32 %v1387_v63, %v1941_v38  ;;  %v855_v4 = vpop.f32.mrb[37].mxu0 }
 0x2f3   :  { %v856_v8 = vadd.f32 %v1941_v38, %v855_v4  ;;  %v1388_v10 = vpop.f32.mrb[38].mxu0 }
 0x2f4   :  { %v931_v47 = vmul.f32 %v1946_v40, %v864_v2  ;;  %v867_v48 = vadd.f32 %v1388_v10, %v1941_v38  ;;  %v858_v11 = vpop.f32.mrb[39].mxu0  ;;  %1116 = vmatmul.mubr.bf16.gmra.mrb[52].mxu0 %v958_v46  ;;  %vm909_vm4 = vcmp.gt.f32.partialorder %v864_v2, 0.0 }
 0x2f5   :  { %v929_v12 = vmul.f32 %v1946_v40, %v856_v8  ;;  %v859_v13 = vadd.f32 %v1941_v38, %v858_v11  ;;  %vm907_vm5 = vcmp.gt.f32.partialorder %v856_v8, 0.0 }
 0x2f6   :  { %vm910_vm6 = vcmp.gt.f32.partialorder %v867_v48, 0.0  ;;  %v932_v14 = vmul.f32 %v1946_v40, %v867_v48  ;;  %v947_v16 = vsel %vm909_vm4, %v864_v2, %v931_v47 }
 0x2f7   :  { %vm908_vm7 = vcmp.gt.f32.partialorder %v859_v13, 0.0  ;;  %v930_v15 = vmul.f32 %v1946_v40, %v859_v13  ;;  %v945_v17 = vsel %vm907_vm5, %v856_v8, %v929_v12 }
 0x2f8   :  { %v948_v49 = vsel %vm910_vm6, %v867_v48, %v932_v14 }
 0x2f9   :  { %v946_v18 = vsel %vm908_vm7, %v859_v13, %v930_v15  ;;  %v960_v19 = vpack.c.bf16 %v948_v49, %v947_v16 }
 0x2fa   :  { %v959_v20 = vpack.c.bf16 %v946_v18, %v945_v17 }
 0x2fc   :  { %1126 = vmatmul.mubr.bf16.vlgmr.msra.gmra.mrb[32].mxu1 %v959_v20 }
 0x2fd   :  { %1135 = vmatprep.mubr.bf16.mxu1 %v1546_v0 }
 0x301   :  { %v1391_v21 = vpop.f32.mrb[40].mxu0 }
 0x302   :  { %v880_v22 = vadd.f32 %v1391_v21, %v1941_v38  ;;  %v871_v23 = vpop.f32.mrb[41].mxu0 }
 0x303   :  { %v872_v24 = vadd.f32 %v1941_v38, %v871_v23  ;;  %v1392_v25 = vpop.f32.mrb[42].mxu0 }
 0x304   :  { %v935_v26 = vmul.f32 %v1946_v40, %v880_v22  ;;  %v883_v27 = vadd.f32 %v1392_v25, %v1941_v38  ;;  %v874_v28 = vpop.f32.mrb[43].mxu0  ;;  %1136 = vmatmul.mubr.bf16.gmra.mrb[36].mxu1 %v960_v19  ;;  %vm913_vm8 = vcmp.gt.f32.partialorder %v880_v22, 0.0 }
 0x305   :  { %v933_v29 = vmul.f32 %v1946_v40, %v872_v24  ;;  %v875_v30 = vadd.f32 %v1941_v38, %v874_v28  ;;  %1145 = vmatprep.mubr.bf16.mxu1 %v1546_v0  ;;  %vm911_vm9 = vcmp.gt.f32.partialorder %v872_v24, 0.0 }
 0x306   :  { %vm914_vm10 = vcmp.gt.f32.partialorder %v883_v27, 0.0  ;;  %v936_v31 = vmul.f32 %v1946_v40, %v883_v27  ;;  %v951_v33 = vsel %vm913_vm8, %v880_v22, %v935_v26 }
 0x307   :  { %vm912_vm11 = vcmp.gt.f32.partialorder %v875_v30, 0.0  ;;  %v934_v32 = vmul.f32 %v1946_v40, %v875_v30  ;;  %v949_v35 = vsel %vm911_vm9, %v872_v24, %v933_v29 }
 0x308   :  { %v952_v34 = vsel %vm914_vm10, %v883_v27, %v936_v31 }
 0x309   :  { %v950_v36 = vsel %vm912_vm11, %v875_v30, %v934_v32  ;;  %v962_v5 = vpack.c.bf16 %v952_v34, %v951_v33 }
 0x30a   :  { %v961_v37 = vpack.c.bf16 %v950_v36, %v949_v35 }
 0x30c   :  { %1146 = vmatmul.mubr.bf16.gmra.mrb[40].mxu1 %v961_v37 }
 0x30d   :  { %1155 = vmatprep.mubr.bf16.mxu1 %v1546_v0 }
 0x311   :  { %v1395_v6 = vpop.f32.mrb[44].mxu0 }
 0x312   :  { %v896_v7 = vadd.f32 %v1395_v6, %v1941_v38  ;;  %v887_v9 = vpop.f32.mrb[45].mxu0 }
 0x313   :  { %v888_v51 = vadd.f32 %v1941_v38, %v887_v9  ;;  %v1396_v55 = vpop.f32.mrb[46].mxu0 }
 0x314   :  { %v939_v39 = vmul.f32 %v1946_v40, %v896_v7  ;;  %v899_v41 = vadd.f32 %v1396_v55, %v1941_v38  ;;  %v890_v50 = vpop.f32.mrb[47].mxu0  ;;  %1156 = vmatmul.mubr.bf16.gmra.mrb[44].mxu1 %v962_v5  ;;  %vm917_vm12 = vcmp.gt.f32.partialorder %v896_v7, 0.0 }
 0x315   :  { %v937_v42 = vmul.f32 %v1946_v40, %v888_v51  ;;  %v891_v52 = vadd.f32 %v1941_v38, %v890_v50  ;;  %1165 = vmatprep.mubr.bf16.mxu1 %v1546_v0  ;;  %vm915_vm13 = vcmp.gt.f32.partialorder %v888_v51, 0.0  ;;  %v981_v38 = vld [vmem:[%s2150_s11] sm:$0x3] }
 0x316   :  { %vm918_vm14 = vcmp.gt.f32.partialorder %v899_v41, 0.0  ;;  %v940_v53 = vmul.f32 %v1946_v40, %v899_v41  ;;  %v955_v56 = vsel %vm917_vm12, %v896_v7, %v939_v39  ;;  %v1990_v59 = vrot.slane %v981_v38, %v1707_v1 }
 0x317   :  { %vm916_vm15 = vcmp.gt.f32.partialorder %v891_v52, 0.0  ;;  %v938_v54 = vmul.f32 %v1946_v40, %v891_v52  ;;  %v953_v57 = vsel %vm915_vm13, %v888_v51, %v937_v42  ;;  %v1993_v60 = vrot.slane %v981_v38, %v1712_v3 }
 0x318   :  { %v956_v43 = vsel %vm918_vm14, %v899_v41, %v940_v53 }
 0x319   :  { %v954_v44 = vsel %vm916_vm15, %v891_v52, %v938_v54  ;;  %v964_v58 = vpack.c.bf16 %v956_v43, %v955_v56 }
 0x31a   :  { %v963_v45 = vpack.c.bf16 %v954_v44, %v953_v57 }
 0x31c   :  { %1166 = vmatmul.mubr.bf16.gmra.mrb[48].mxu1 %v963_v45 }
 0x31d   :  { %1175 = vmatprep.mubr.bf16.mxu1 %v1546_v0 }
 0x324   :  { %1176 = vmatmul.mubr.bf16.gmra.mrb[52].mxu1 %v964_v58 }
 0x3bf   :  { %v1107_v40 = vpop.f32.mrb[48].mxu0 }
 0x3c0   :  { %v1108_v61 = vadd.f32 %v1107_v40, %v1990_v59  ;;  %v1109_v46 = vpop.f32.mrb[49].mxu0 }
 0x3c1   :  { %v1110_v62 = vadd.f32 %v1109_v46, %v1993_v60  ;;  %v1111_v63 = vpop.f32.mrb[50].mxu0 }
 0x3c2   :  { %1186 = vst [vmem:[%s2151_s12] sm:$0xff] %v1108_v61  ;;  %v1112_v0 = vadd.f32 %v1111_v63, %v1990_v59  ;;  %v1113_v2 = vpop.f32.mrb[51].mxu0 }
 0x3c3   :  { %1188 = vst.msk [vmem:[%s2151_s12 + $0x8] sm:$0xff] %vm1187_vm0, %v1110_v62  ;;  %v1114_v1 = vadd.f32 %v1113_v2, %v1993_v60 }
 0x3c4   :  { %1189 = vst [vmem:[%s2151_s12 + $0x10] sm:$0xff] %v1112_v0 }
 0x3c5   :  { %1190 = vst.msk [vmem:[%s2151_s12 + $0x18] sm:$0xff] %vm1187_vm0, %v1114_v1 }
 0x3c7   :  { %v1117_v3 = vpop.f32.mrb[52].mxu0 }
 0x3c8   :  { %v1118_v4 = vadd.f32 %v1117_v3, %v1990_v59  ;;  %v1119_v8 = vpop.f32.mrb[53].mxu0 }
 0x3c9   :  { %v1120_v10 = vadd.f32 %v1119_v8, %v1993_v60  ;;  %v1121_v47 = vpop.f32.mrb[54].mxu0 }
 0x3ca   :  { %1191 = vst [vmem:[%s2151_s12 + $0x20] sm:$0xff] %v1118_v4  ;;  %v1122_v48 = vadd.f32 %v1121_v47, %v1990_v59  ;;  %v1123_v11 = vpop.f32.mrb[55].mxu0 }
 0x3cb   :  { %1192 = vst.msk [vmem:[%s2151_s12 + $0x28] sm:$0xff] %vm1187_vm0, %v1120_v10  ;;  %v1124_v12 = vadd.f32 %v1123_v11, %v1993_v60 }
 0x3cc   :  { %1193 = vst [vmem:[%s2151_s12 + $0x30] sm:$0xff] %v1122_v48 }
 0x3cd   :  { %1194 = vst.msk [vmem:[%s2151_s12 + $0x38] sm:$0xff] %vm1187_vm0, %v1124_v12 }
 0x3cf   :  { %v1127_v13 = vpop.f32.mrb[32].mxu1 }
 0x3d0   :  { %v1128_v14 = vadd.f32 %v1127_v13, %v1990_v59  ;;  %v1129_v15 = vpop.f32.mrb[33].mxu1 }
 0x3d1   :  { %v1130_v16 = vadd.f32 %v1129_v15, %v1993_v60  ;;  %v1131_v49 = vpop.f32.mrb[34].mxu1 }
 0x3d2   :  { %1195 = vst [vmem:[%s2151_s12 + $0x40] sm:$0xff] %v1128_v14  ;;  %v1132_v17 = vadd.f32 %v1131_v49, %v1990_v59  ;;  %v1133_v18 = vpop.f32.mrb[35].mxu1 }
 0x3d3   :  { %1196 = vst.msk [vmem:[%s2151_s12 + $0x48] sm:$0xff] %vm1187_vm0, %v1130_v16  ;;  %v1134_v19 = vadd.f32 %v1133_v18, %v1993_v60 }
 0x3d4   :  { %1197 = vst [vmem:[%s2151_s12 + $0x50] sm:$0xff] %v1132_v17 }
 0x3d5   :  { %1198 = vst.msk [vmem:[%s2151_s12 + $0x58] sm:$0xff] %vm1187_vm0, %v1134_v19 }
 0x3d7   :  { %v1137_v20 = vpop.f32.mrb[36].mxu1 }
 0x3d8   :  { %v1138_v21 = vadd.f32 %v1137_v20, %v1990_v59  ;;  %v1139_v22 = vpop.f32.mrb[37].mxu1 }
 0x3d9   :  { %v1140_v23 = vadd.f32 %v1139_v22, %v1993_v60  ;;  %v1141_v24 = vpop.f32.mrb[38].mxu1 }
 0x3da   :  { %1199 = vst [vmem:[%s2151_s12 + $0x60] sm:$0xff] %v1138_v21  ;;  %v1142_v25 = vadd.f32 %v1141_v24, %v1990_v59  ;;  %v1143_v26 = vpop.f32.mrb[39].mxu1 }
 0x3db   :  { %1200 = vst.msk [vmem:[%s2151_s12 + $0x68] sm:$0xff] %vm1187_vm0, %v1140_v23  ;;  %v1144_v27 = vadd.f32 %v1143_v26, %v1993_v60 }
 0x3dc   :  { %1201 = vst [vmem:[%s2151_s12 + $0x70] sm:$0xff] %v1142_v25 }
 0x3dd   :  { %1202 = vst.msk [vmem:[%s2151_s12 + $0x78] sm:$0xff] %vm1187_vm0, %v1144_v27 }
 0x3df   :  { %v1147_v28 = vpop.f32.mrb[40].mxu1 }
 0x3e0   :  { %v1148_v29 = vadd.f32 %v1147_v28, %v1990_v59  ;;  %v1149_v30 = vpop.f32.mrb[41].mxu1 }
 0x3e1   :  { %v1150_v31 = vadd.f32 %v1149_v30, %v1993_v60  ;;  %v1151_v32 = vpop.f32.mrb[42].mxu1 }
 0x3e2   :  { %1203 = vst [vmem:[%s2151_s12 + $0x80] sm:$0xff] %v1148_v29  ;;  %v1152_v33 = vadd.f32 %v1151_v32, %v1990_v59  ;;  %v1153_v34 = vpop.f32.mrb[43].mxu1 }
 0x3e3   :  { %1204 = vst.msk [vmem:[%s2151_s12 + $0x88] sm:$0xff] %vm1187_vm0, %v1150_v31  ;;  %v1154_v35 = vadd.f32 %v1153_v34, %v1993_v60 }
 0x3e4   :  { %1205 = vst [vmem:[%s2151_s12 + $0x90] sm:$0xff] %v1152_v33 }
 0x3e5   :  { %1206 = vst.msk [vmem:[%s2151_s12 + $0x98] sm:$0xff] %vm1187_vm0, %v1154_v35 }
 0x3e7   :  { %v1157_v36 = vpop.f32.mrb[44].mxu1 }
 0x3e8   :  { %v1158_v5 = vadd.f32 %v1157_v36, %v1990_v59  ;;  %v1159_v37 = vpop.f32.mrb[45].mxu1 }
 0x3e9   :  { %v1160_v6 = vadd.f32 %v1159_v37, %v1993_v60  ;;  %v1161_v7 = vpop.f32.mrb[46].mxu1 }
 0x3ea   :  { %1207 = vst [vmem:[%s2151_s12 + $0xa0] sm:$0xff] %v1158_v5  ;;  %v1162_v9 = vadd.f32 %v1161_v7, %v1990_v59  ;;  %v1163_v51 = vpop.f32.mrb[47].mxu1 }
 0x3eb   :  { %1208 = vst.msk [vmem:[%s2151_s12 + $0xa8] sm:$0xff] %vm1187_vm0, %v1160_v6  ;;  %v1164_v55 = vadd.f32 %v1163_v51, %v1993_v60 }
 0x3ec   :  { %1209 = vst [vmem:[%s2151_s12 + $0xb0] sm:$0xff] %v1162_v9 }
 0x3ed   :  { %1210 = vst.msk [vmem:[%s2151_s12 + $0xb8] sm:$0xff] %vm1187_vm0, %v1164_v55 }
 0x3ef   :  { %v1167_v39 = vpop.f32.mrb[48].mxu1 }
 0x3f0   :  { %v1168_v41 = vadd.f32 %v1167_v39, %v1990_v59  ;;  %v1169_v50 = vpop.f32.mrb[49].mxu1 }
 0x3f1   :  { %v1170_v42 = vadd.f32 %v1169_v50, %v1993_v60  ;;  %v1171_v52 = vpop.f32.mrb[50].mxu1 }
 0x3f2   :  { %1211 = vst [vmem:[%s2151_s12 + $0xc0] sm:$0xff] %v1168_v41  ;;  %v1172_v53 = vadd.f32 %v1171_v52, %v1990_v59  ;;  %v1173_v54 = vpop.f32.mrb[51].mxu1 }
 0x3f3   :  { %1212 = vst.msk [vmem:[%s2151_s12 + $0xc8] sm:$0xff] %vm1187_vm0, %v1170_v42  ;;  %v1174_v56 = vadd.f32 %v1173_v54, %v1993_v60 }
 0x3f4   :  { %1213 = vst [vmem:[%s2151_s12 + $0xd0] sm:$0xff] %v1172_v53 }
 0x3f5   :  { %1214 = vst.msk [vmem:[%s2151_s12 + $0xd8] sm:$0xff] %vm1187_vm0, %v1174_v56 }
 0x3f7   :  { %v1177_v43 = vpop.f32.mrb[52].mxu1 }
 0x3f8   :  { %v1178_v57 = vadd.f32 %v1177_v43, %v1990_v59  ;;  %v1179_v44 = vpop.f32.mrb[53].mxu1 }
 0x3f9   :  { %v1180_v58 = vadd.f32 %v1179_v44, %v1993_v60  ;;  %v1181_v45 = vpop.f32.mrb[54].mxu1 }
 0x3fa   :  { %1215 = vst [vmem:[%s2151_s12 + $0xe0] sm:$0xff] %v1178_v57  ;;  %v1182_v38 = vadd.f32 %v1181_v45, %v1990_v59  ;;  %v1183_v40 = vpop.f32.mrb[55].mxu1 }
 0x3fb   :  { %1216 = vst.msk [vmem:[%s2151_s12 + $0xe8] sm:$0xff] %vm1187_vm0, %v1180_v58  ;;  %v1184_v61 = vadd.f32 %v1183_v40, %v1993_v60 }
 0x3fc   :  { %1217 = vst [vmem:[%s2151_s12 + $0xf0] sm:$0xff] %v1182_v38 }
 0x3fd   :  { %1218 = vst.msk [vmem:[%s2151_s12 + $0xf8] sm:$0xff] %vm1187_vm0, %v1184_v61 }
 0x3fe   :  { %1223 = vsyncpa [#allocation3], 1 }
 0x3ff   :  { %1224 = vsyncpa [#allocation5], 1 }

</bundles_post_ra>
